<compile_context>
chip_gen: v5e
topology: v5e:2x2
jax: 0.10.0
libtpu: 0.0.40
codegen_flags: <defaults>
</compile_context>

<pallas_src>
import jax
import jax.numpy as jnp
from jax.experimental import pallas as pl
from jax.experimental.pallas import tpu as pltpu


N_PAD = 128      # node axis padded to a full lane width (lane-dense adjacency)
LANE = 128       # every feature / class axis padded to 128 lanes
POOL_ROWS = 16   # pooled-graph rows in the bf16/f32 slabs (bf16 sublane tile)
NUM_W = 6        # wl1, wr1, wl2, wr2, w_lin1, w_lin2


def _graphsage_kernel(x_ref, g_ref, w_ref, b_ref, mask_ref, out_ref):
    """Operand layout (all lane-dense):
         x_ref:    (N_PAD, LANE)             bf16  node features
         g_ref:    (N_PAD + POOL_ROWS, LANE) bf16  [adjacency ; pooling matrix]
         w_ref:    (NUM_W*LANE, LANE)        bf16  [wl1; wr1; wl2; wr2; w1; w2]
         b_ref:    (8, LANE)                 f32   rows 0..3 = bl1, bl2, b1, b2
         mask_ref: (POOL_ROWS, LANE)         f32   dropout keep/scale mask {0,2}
         out_ref:  (POOL_ROWS, LANE)         f32   lane-dense logits slab
    """
    f32, bf16 = jnp.float32, jnp.bfloat16

    x = x_ref[...]
    adj = g_ref[0:N_PAD, :]
    pool = g_ref[N_PAD:N_PAD + POOL_ROWS, :]

    def w(i):   # static, tile-aligned slice of the packed weight slab
        return w_ref[i * LANE:(i + 1) * LANE, :]

    def b(i):   # static single-row bias slice (broadcasts over rows)
        return b_ref[i:i + 1, :]

    # ---- SAGEConv1 + ReLU:  h1 = relu((A @ x) @ Wl1 + x @ Wr1 + bl1) -------
    agg1 = jnp.dot(adj, x, preferred_element_type=f32)
    h1 = (jnp.dot(agg1.astype(bf16), w(0), preferred_element_type=f32)
          + jnp.dot(x, w(1), preferred_element_type=f32) + b(0))
    h1 = jnp.maximum(h1, 0.0).astype(bf16)

    # ---- SAGEConv2 + ReLU ---------------------------------------------------
    agg2 = jnp.dot(adj, h1, preferred_element_type=f32)
    h2 = (jnp.dot(agg2.astype(bf16), w(2), preferred_element_type=f32)
          + jnp.dot(h1, w(3), preferred_element_type=f32) + b(1))
    h2 = jnp.maximum(h2, 0.0).astype(bf16)

    # ---- global_mean_pool (dense pooling matmul) ----------------------------
    g = jnp.dot(pool, h2, preferred_element_type=f32)          # (POOL_ROWS, LANE)

    # ---- lin1 -> dropout(p=0.5) -> lin2 (lane-dense output store) -----------
    y = jnp.dot(g.astype(bf16), w(4), preferred_element_type=f32) + b(2)
    y = y * mask_ref[...]
    out_ref[...] = (jnp.dot(y.astype(bf16), w(5), preferred_element_type=f32)
                    + b(3))


@jax.jit
def graphsage_forward_padded(x_pad, graph_slab, w_slab, b_slab, mask):
    """Runs the fused kernel; returns the padded (POOL_ROWS, LANE) logits."""
    vmem = pl.BlockSpec(memory_space=pltpu.MemorySpace.VMEM)
    return pl.pallas_call(
        _graphsage_kernel,
        out_shape=jax.ShapeDtypeStruct((POOL_ROWS, LANE), jnp.float32),
        in_specs=[vmem] * 5,
        out_specs=vmem,
    )(x_pad, graph_slab, w_slab, b_slab, mask)


# --------------------------- one-time host prep ------------------------------
def _pad2(a, rows, cols):
    out = jnp.zeros((rows, cols), jnp.float32)
    return out.at[:a.shape[0], :a.shape[1]].set(a)


def prepare_inputs(x, adj, pool, wl1, bl1, wr1, wl2, bl2, wr2, w1, b1, w2, b2):
    """Pad / pack / cast all operands once (hoisted out of the forward)."""
    bf = jnp.bfloat16

    x_pad = _pad2(x, N_PAD, LANE).astype(bf)                         # (128, 128)
    graph_slab = jnp.concatenate(
        [_pad2(adj, N_PAD, LANE), _pad2(pool, POOL_ROWS, LANE)],
        axis=0).astype(bf)                                           # (144, 128)
    w_slab = jnp.concatenate(
        [_pad2(w, LANE, LANE) for w in (wl1, wr1, wl2, wr2, w1, w2)],
        axis=0).astype(bf)                                           # (768, 128)
    b_slab = jnp.zeros((8, LANE), jnp.float32)
    for i, bb in enumerate((bl1, bl2, b1, b2)):
        b_slab = b_slab.at[i:i + 1, :bb.shape[1]].set(bb)            # (8, 128)
    return x_pad, graph_slab, w_slab, b_slab


# ----------------------------- glue / setup ----------------------------------
def build_dense_adjacency(edge_index, num_nodes):
    """Row-normalized adjacency: A[i, j] = 1/deg_in(i) for each edge j->i."""
    src, dst = edge_index
    a = jnp.zeros((num_nodes, num_nodes), jnp.float32)
    a = a.at[dst, src].add(1.0)
    deg = jnp.sum(a, axis=1, keepdims=True)
    return a / jnp.maximum(deg, 1.0)


def build_pool_matrix(batch, num_graphs, num_nodes):
    """P[g, n] = 1/|graph g| if node n in graph g."""
    p = jnp.zeros((num_graphs, num_nodes), jnp.float32)
    p = p.at[batch, jnp.arange(num_nodes)].set(1.0)
    cnt = jnp.sum(p, axis=1, keepdims=True)
    return p / jnp.maximum(cnt, 1.0)


def init_linear(key, fan_in, fan_out, bias=True):
    """PyTorch Linear-style uniform init; weight returned as (in, out)."""
    kw, kb = jax.random.split(key)
    bound = 1.0 / jnp.sqrt(fan_in)
    w = jax.random.uniform(kw, (fan_in, fan_out), jnp.float32, -bound, bound)
    if bias:
        b = jax.random.uniform(kb, (1, fan_out), jnp.float32, -bound, bound)
        return w, b
    return w, None


def reference_forward(x, adj, pool, wl1, bl1, wr1, wl2, bl2, wr2,
                      w1, b1, w2, b2, mask_real):
    """Pure-JAX f32 reference with identical dropout mask."""
    h1 = jax.nn.relu(adj @ x @ wl1 + x @ wr1 + bl1)
    h2 = jax.nn.relu(adj @ h1 @ wl2 + h1 @ wr2 + bl2)
    g = pool @ h2
    y = (g @ w1 + b1) * mask_real
    return y @ w2 + b2


if __name__ == "__main__":
    in_channels, hidden_channels, out_channels, num_classes = 8, 32, 16, 4
    num_nodes, num_graphs = 16, 2
    lin1_width = out_channels // 2

    key = jax.random.PRNGKey(0)
    keys = jax.random.split(key, 9)

    # Node features.
    x = jax.random.normal(keys[0], (num_nodes, in_channels), jnp.float32)

    # Two ring graphs of 8 nodes each (deterministic edge_index).
    edges = []
    for gidx in range(num_graphs):
        base = gidx * 8
        for i in range(8):
            edges.append((base + i, base + (i + 1) % 8))
            edges.append((base + (i + 1) % 8, base + i))
    edge_index = jnp.asarray(edges, jnp.int32).T           # (2, E)
    batch = jnp.asarray([0] * 8 + [1] * 8, jnp.int32)

    adj = build_dense_adjacency(edge_index, num_nodes)
    pool = build_pool_matrix(batch, num_graphs, num_nodes)

    # Parameters (deterministic).
    wl1, bl1 = init_linear(keys[1], in_channels, hidden_channels)           # conv1 lin_l
    wr1, _ = init_linear(keys[2], in_channels, hidden_channels, False)      # conv1 lin_r
    wl2, bl2 = init_linear(keys[3], hidden_channels, out_channels)          # conv2 lin_l
    wr2, _ = init_linear(keys[4], hidden_channels, out_channels, False)     # conv2 lin_r
    w1, b1 = init_linear(keys[5], out_channels, lin1_width)                 # lin1
    w2, b2 = init_linear(keys[6], lin1_width, num_classes)                  # lin2

    # One-time host prep: pad + pack + bf16 cast.
    x_pad, graph_slab, w_slab, b_slab = prepare_inputs(
        x, adj, pool, wl1, bl1, wr1, wl2, bl2, wr2, w1, b1, w2, b2)

    # Fresh dropout keep/scale mask per forward: Bernoulli(0.5) * 1/(1-p)=2.
    keep = jax.random.bernoulli(keys[7], 0.5, (POOL_ROWS, LANE))
    dropout_mask = keep.astype(jnp.float32) * 2.0

    out_pad = graphsage_forward_padded(x_pad, graph_slab, w_slab, b_slab,
                                       dropout_mask)
    jax.block_until_ready(out_pad)
    out = out_pad[:num_graphs, :num_classes]

    # Sanity-check against a pure-JAX f32 reference (kernel matmuls are bf16,
    # so tolerance is loose).
    ref = reference_forward(x, adj, pool, wl1, bl1, wr1, wl2, bl2, wr2,
                            w1, b1, w2, b2,
                            dropout_mask[:num_graphs, :lin1_width])
    assert out.shape == (num_graphs, num_classes)
    assert bool(jnp.all(jnp.isfinite(out)))
    assert bool(jnp.allclose(out, ref, atol=1e-1, rtol=1e-1)), (out, ref)
    print("KERNEL_OK")
</pallas_src>

<mosaic_0001>
module attributes {stable_mosaic.version = 11 : i64} {
  func.func @_graphsage_kernel(%arg0: memref<128x128xbf16, #tpu.memory_space<vmem>>, %arg1: memref<144x128xbf16, #tpu.memory_space<vmem>>, %arg2: memref<768x128xbf16, #tpu.memory_space<vmem>>, %arg3: memref<8x128xf32, #tpu.memory_space<vmem>>, %arg4: memref<16x128xf32, #tpu.memory_space<vmem>>, %arg5: memref<16x128xf32, #tpu.memory_space<vmem>>) attributes {dimension_semantics = [], scalar_prefetch = 0 : i64, scratch_operands = 0 : i64, tpu.core_type = #tpu.core_type<tc>} {
    %c0 = arith.constant 0 : index
    %c0_0 = arith.constant 0 : index
    %0 = vector.load %arg0[%c0, %c0_0] : memref<128x128xbf16, #tpu.memory_space<vmem>>, vector<128x128xbf16>
    %c0_1 = arith.constant 0 : index
    %c0_2 = arith.constant 0 : index
    %1 = vector.load %arg1[%c0_1, %c0_2] : memref<144x128xbf16, #tpu.memory_space<vmem>>, vector<128x128xbf16>
    %c128 = arith.constant 128 : index
    %c0_3 = arith.constant 0 : index
    %2 = vector.load %arg1[%c128, %c0_3] : memref<144x128xbf16, #tpu.memory_space<vmem>>, vector<16x128xbf16>
    %cst = arith.constant dense<0.000000e+00> : vector<128x128xf32>
    %3 = tpu.matmul %1, %0, %cst {dimension_numbers = #tpu.dot_dimension_numbers<[1], [0], [0], [1], [0, 0, 1, 1], [], []>} : vector<128x128xbf16>, vector<128x128xbf16>, vector<128x128xf32> -> vector<128x128xf32>
    %4 = arith.truncf %3 : vector<128x128xf32> to vector<128x128xbf16>
    %c0_4 = arith.constant 0 : index
    %c0_5 = arith.constant 0 : index
    %5 = vector.load %arg2[%c0_4, %c0_5] : memref<768x128xbf16, #tpu.memory_space<vmem>>, vector<128x128xbf16>
    %cst_6 = arith.constant dense<0.000000e+00> : vector<128x128xf32>
    %6 = tpu.matmul %4, %5, %cst_6 {dimension_numbers = #tpu.dot_dimension_numbers<[1], [0], [0], [1], [0, 0, 1, 1], [], []>} : vector<128x128xbf16>, vector<128x128xbf16>, vector<128x128xf32> -> vector<128x128xf32>
    %c128_7 = arith.constant 128 : index
    %c0_8 = arith.constant 0 : index
    %7 = vector.load %arg2[%c128_7, %c0_8] : memref<768x128xbf16, #tpu.memory_space<vmem>>, vector<128x128xbf16>
    %cst_9 = arith.constant dense<0.000000e+00> : vector<128x128xf32>
    %8 = tpu.matmul %0, %7, %cst_9 {dimension_numbers = #tpu.dot_dimension_numbers<[1], [0], [0], [1], [0, 0, 1, 1], [], []>} : vector<128x128xbf16>, vector<128x128xbf16>, vector<128x128xf32> -> vector<128x128xf32>
    %9 = arith.addf %6, %8 : vector<128x128xf32>
    %c0_10 = arith.constant 0 : index
    %c0_11 = arith.constant 0 : index
    %10 = vector.load %arg3[%c0_10, %c0_11] : memref<8x128xf32, #tpu.memory_space<vmem>>, vector<1x128xf32>
    %11 = vector.broadcast %10 : vector<1x128xf32> to vector<128x128xf32>
    %12 = arith.addf %9, %11 : vector<128x128xf32>
    %cst_12 = arith.constant 0.000000e+00 : f32
    %13 = vector.broadcast %cst_12 : f32 to vector<128x128xf32>
    %14 = arith.maximumf %12, %13 : vector<128x128xf32>
    %15 = arith.truncf %14 : vector<128x128xf32> to vector<128x128xbf16>
    %cst_13 = arith.constant dense<0.000000e+00> : vector<128x128xf32>
    %16 = tpu.matmul %1, %15, %cst_13 {dimension_numbers = #tpu.dot_dimension_numbers<[1], [0], [0], [1], [0, 0, 1, 1], [], []>} : vector<128x128xbf16>, vector<128x128xbf16>, vector<128x128xf32> -> vector<128x128xf32>
    %17 = arith.truncf %16 : vector<128x128xf32> to vector<128x128xbf16>
    %c256 = arith.constant 256 : index
    %c0_14 = arith.constant 0 : index
    %18 = vector.load %arg2[%c256, %c0_14] : memref<768x128xbf16, #tpu.memory_space<vmem>>, vector<128x128xbf16>
    %cst_15 = arith.constant dense<0.000000e+00> : vector<128x128xf32>
    %19 = tpu.matmul %17, %18, %cst_15 {dimension_numbers = #tpu.dot_dimension_numbers<[1], [0], [0], [1], [0, 0, 1, 1], [], []>} : vector<128x128xbf16>, vector<128x128xbf16>, vector<128x128xf32> -> vector<128x128xf32>
    %c384 = arith.constant 384 : index
    %c0_16 = arith.constant 0 : index
    %20 = vector.load %arg2[%c384, %c0_16] : memref<768x128xbf16, #tpu.memory_space<vmem>>, vector<128x128xbf16>
    %cst_17 = arith.constant dense<0.000000e+00> : vector<128x128xf32>
    %21 = tpu.matmul %15, %20, %cst_17 {dimension_numbers = #tpu.dot_dimension_numbers<[1], [0], [0], [1], [0, 0, 1, 1], [], []>} : vector<128x128xbf16>, vector<128x128xbf16>, vector<128x128xf32> -> vector<128x128xf32>
    %22 = arith.addf %19, %21 : vector<128x128xf32>
    %c1 = arith.constant 1 : index
    %c0_18 = arith.constant 0 : index
    %23 = vector.load %arg3[%c1, %c0_18] : memref<8x128xf32, #tpu.memory_space<vmem>>, vector<1x128xf32>
    %24 = vector.broadcast %23 : vector<1x128xf32> to vector<128x128xf32>
    %25 = arith.addf %22, %24 : vector<128x128xf32>
    %cst_19 = arith.constant 0.000000e+00 : f32
    %26 = vector.broadcast %cst_19 : f32 to vector<128x128xf32>
    %27 = arith.maximumf %25, %26 : vector<128x128xf32>
    %28 = arith.truncf %27 : vector<128x128xf32> to vector<128x128xbf16>
    %cst_20 = arith.constant dense<0.000000e+00> : vector<16x128xf32>
    %29 = tpu.matmul %2, %28, %cst_20 {dimension_numbers = #tpu.dot_dimension_numbers<[1], [0], [0], [1], [0, 0, 1, 1], [], []>} : vector<16x128xbf16>, vector<128x128xbf16>, vector<16x128xf32> -> vector<16x128xf32>
    %30 = arith.truncf %29 : vector<16x128xf32> to vector<16x128xbf16>
    %c512 = arith.constant 512 : index
    %c0_21 = arith.constant 0 : index
    %31 = vector.load %arg2[%c512, %c0_21] : memref<768x128xbf16, #tpu.memory_space<vmem>>, vector<128x128xbf16>
    %cst_22 = arith.constant dense<0.000000e+00> : vector<16x128xf32>
    %32 = tpu.matmul %30, %31, %cst_22 {dimension_numbers = #tpu.dot_dimension_numbers<[1], [0], [0], [1], [0, 0, 1, 1], [], []>} : vector<16x128xbf16>, vector<128x128xbf16>, vector<16x128xf32> -> vector<16x128xf32>
    %c2 = arith.constant 2 : index
    %c0_23 = arith.constant 0 : index
    %33 = vector.load %arg3[%c2, %c0_23] : memref<8x128xf32, #tpu.memory_space<vmem>>, vector<1x128xf32>
    %34 = vector.broadcast %33 : vector<1x128xf32> to vector<16x128xf32>
    %35 = arith.addf %32, %34 : vector<16x128xf32>
    %c0_24 = arith.constant 0 : index
    %c0_25 = arith.constant 0 : index
    %36 = vector.load %arg4[%c0_24, %c0_25] : memref<16x128xf32, #tpu.memory_space<vmem>>, vector<16x128xf32>
    %37 = arith.mulf %35, %36 : vector<16x128xf32>
    %38 = arith.truncf %37 : vector<16x128xf32> to vector<16x128xbf16>
    %c640 = arith.constant 640 : index
    %c0_26 = arith.constant 0 : index
    %39 = vector.load %arg2[%c640, %c0_26] : memref<768x128xbf16, #tpu.memory_space<vmem>>, vector<128x128xbf16>
    %cst_27 = arith.constant dense<0.000000e+00> : vector<16x128xf32>
    %40 = tpu.matmul %38, %39, %cst_27 {dimension_numbers = #tpu.dot_dimension_numbers<[1], [0], [0], [1], [0, 0, 1, 1], [], []>} : vector<16x128xbf16>, vector<128x128xbf16>, vector<16x128xf32> -> vector<16x128xf32>
    %c3 = arith.constant 3 : index
    %c0_28 = arith.constant 0 : index
    %41 = vector.load %arg3[%c3, %c0_28] : memref<8x128xf32, #tpu.memory_space<vmem>>, vector<1x128xf32>
    %42 = vector.broadcast %41 : vector<1x128xf32> to vector<16x128xf32>
    %43 = arith.addf %40, %42 : vector<16x128xf32>
    %c0_29 = arith.constant 0 : index
    %c0_30 = arith.constant 0 : index
    %44 = vector.load %arg5[%c0_29, %c0_30] : memref<16x128xf32, #tpu.memory_space<vmem>>, vector<16x128xf32>
    tpu.vector_store %arg5[%c0_29, %c0_30], %43 {strides = array<i32>} : memref<16x128xf32, #tpu.memory_space<vmem>>, vector<16x128xf32>,
    return
  }
}

</mosaic_0001>

<bundles_post_ra>
// kernel: graphsage_forward_padded.1
= control target key start
LH: loop header
LB: loop body
LE: loop exit
PB: predicated region body
PF: predicated region fallthrough
CT: control target
= control target key end

     0   :  { %10 = vsyncpa [#allocation3], 0  ;;  %s1785_s0 = inlined_call_operand.hbm [shape: bf16[128,128], index: 0, kind: input, shape index: {}]   ;;  %s1786_s1 = inlined_call_operand.hbm [shape: bf16[144,128], index: 1, kind: input, shape index: {}]   ;;  %s1787_s2 = inlined_call_operand.hbm [shape: bf16[768,128], index: 2, kind: input, shape index: {}]   ;;  %s1788_s3 = inlined_call_operand.hbm [shape: f32[8,128], index: 3, kind: input, shape index: {}]   ;;  %s1789_s4 = inlined_call_operand.hbm [shape: f32[16,128], index: 4, kind: input, shape index: {}]   ;;  %s1790_s5 = inlined_call_operand.hbm [shape: f32[16,128], index: 5, kind: output, shape index: {}]  }
   0x1   :  { %11 = vsyncpa [#allocation6], 0 }
   0x2   :  { %12 = vsyncpa [#allocation9], 0 }
   0x3   :  { %13 = vsyncpa [#allocation4], 0  ;;  %s31_s20 = sshll.u32 %s1786_s1, 4  ;;  %s1593_s21 = smov [#allocation5]   ;;  %s32_s20 = int_to_ptr.hbm [resolvable:$true] %s31_s20 }
   0x4   :  { %s33_s22 = sshll.u32 %s1593_s21, 4  ;;  %s58_s25 = sshll.u32 %s1788_s3, 4  ;;  %s34_s22 = int_to_ptr.vmem [resolvable:$true] %s33_s22  ;;  %s59_s25 = int_to_ptr.hbm [resolvable:$true] %s58_s25 }
   0x5   :  { %s1594_s26 = smov 64   ;;  %s1595_s27 = smov 4  }
   0x6   :  { %39 = dma.hbm_to_vmem [thread:$0]  %s32_s20, 1152, %s34_s22, [#allocation6], %s1594_s26, %s1594_s26, %s1595_s27  }
   0x7   :  { %s1596_s28 = smov [#allocation8]   ;;  %s18_s7 = sshll.u32 %s1785_s0, 4  ;;  %s19_s7 = int_to_ptr.hbm [resolvable:$true] %s18_s7 }
   0x8   :  { %s60_s29 = sshll.u32 %s1596_s28, 4  ;;  %s44_s9 = sshll.u32 %s1787_s2, 4  ;;  %s61_s29 = int_to_ptr.vmem [resolvable:$true] %s60_s29  ;;  %s45_s9 = int_to_ptr.hbm [resolvable:$true] %s44_s9 }
   0x9   :  { %63 = dma.hbm_to_vmem [thread:$0]  %s59_s25, 128, %s61_s29, [#allocation9]  }
   0xa   :  { %s1597_s10 = smov [#allocation2]   ;;  %s1598_s3 = smov [#allocation7]  }
   0xb   :  { %s20_s11 = sshll.u32 %s1597_s10, 4  ;;  %s46_s12 = sshll.u32 %s1598_s3, 4  ;;  %s21_s11 = int_to_ptr.vmem [resolvable:$true] %s20_s11  ;;  %s47_s12 = int_to_ptr.vmem [resolvable:$true] %s46_s12 }
   0xc   :  { %26 = dma.hbm_to_vmem [thread:$0]  %s19_s7, 1024, %s21_s11, [#allocation3], %s1594_s26, %s1594_s26, %s1595_s27  }
   0xd   :  { %s68_s15 = sshll.u32 %s1789_s4, 4  ;;  %s1599_s0 = smov [#allocation10]   ;;  %s69_s15 = int_to_ptr.hbm [resolvable:$true] %s68_s15 }
   0xe   :  { %52 = dma.hbm_to_vmem [thread:$0]  %s45_s9, 6144, %s47_s12, [#allocation6], %s1594_s26, %s1594_s26, %s1595_s27  }
   0xf   :  { %s70_s16 = sshll.u32 %s1599_s0, 4  ;;  %s1600_s17 = smov 128   ;;  %s71_s16 = int_to_ptr.vmem [resolvable:$true] %s70_s16 }
  0x10   :  { %s1601_s18 = smov 8  }
  0x11   :  { %76 = dma.hbm_to_vmem [thread:$0]  %s69_s15, 256, %s71_s16, [#allocation9], %s1600_s17, %s1600_s17, %s1601_s18  }
  0x12   :  { %1585 = dma.done.wait [#allocation3], 1024  }
  0x13   :  { %1586 = vsyncadd [#allocation3], 4294966272 }
  0x14   :  { %1587 = dma.done.wait [#allocation6], 7296  }
  0x15   :  { %1588 = vsyncadd [#allocation6], 4294960000 }
  0x16   :  { %1589 = dma.done.wait [#allocation9], 384  }
  0x17   :  { %1590 = vsyncadd [#allocation9], 4294966912  ;;  %v1651_v0 = vld [vmem:[#allocation2 + $0x38] sm:$0xff]  ;;  %v1654_v1 = vld [vmem:[#allocation2 + $0x30] sm:$0xff]  ;;  %s1602_s2 = smov [#allocation11]   ;;  %s1071_s21 = sshll.u32 %s1790_s5, 4  ;;  %s1072_s21 = int_to_ptr.hbm [resolvable:$true] %s1071_s21 }
  0x18   :  { %227 = vmatpush.bf16.msra.mxu0 %v1651_v0  ;;  %1411 = vmatpush.bf16.msra.mxu3 %v1651_v0  ;;  %v1351_v2 = vld [vmem:[#allocation2 + $0x28] sm:$0xff]  ;;  %v1659_v3 = vld [vmem:[#allocation2 + $0x20] sm:$0xff]  ;;  %v1662_v4 = vld [vmem:[#allocation2 + $0x18] sm:$0xff]  ;;  %s1069_s4 = sshll.u32 %s1602_s2, 4  ;;  %s1070_s4 = int_to_ptr.vmem [resolvable:$true] %s1069_s4 }
  0x19   :  { %v1666_v5 = vld [vmem:[#allocation2 + $0x10] sm:$0xff]  ;;  %v1347_v6 = vld [vmem:[#allocation2 + $0x8] sm:$0xff]  ;;  %v1346_v7 = vld [vmem:[#allocation2] sm:$0xff] }
  0x1a   :  { %v1671_v8 = vld [vmem:[#allocation5] sm:$0xff]  ;;  %v1674_v9 = vld [vmem:[#allocation5 + $0x8] sm:$0xff]  ;;  %v1377_v11 = vld [vmem:[#allocation7 + $0x70] sm:$0xff] }
  0x1b   :  { %v1378_v10 = vld [vmem:[#allocation7 + $0x78] sm:$0xff]  ;;  %v1376_v12 = vld [vmem:[#allocation7 + $0x68] sm:$0xff]  ;;  %v1375_v13 = vld [vmem:[#allocation7 + $0x60] sm:$0xff] }
  0x1c   :  { %228 = vmatpush.bf16.msra.mxu0 %v1654_v1  ;;  %1412 = vmatpush.bf16.msra.mxu3 %v1654_v1  ;;  %v1677_v14 = vld [vmem:[#allocation5 + $0x10] sm:$0xff]  ;;  %v1374_v15 = vld [vmem:[#allocation7 + $0x58] sm:$0xff]  ;;  %v1680_v16 = vld [vmem:[#allocation5 + $0x28] sm:$0xff] }
  0x1d   :  { %1419 = vmatpush.bf16.msra.mxu2 %v1378_v10  ;;  %364 = vmatpush.bf16.msra.mxu1 %v1378_v10  ;;  %v1373_v17 = vld [vmem:[#allocation7 + $0x50] sm:$0xff]  ;;  %v1372_v18 = vld [vmem:[#allocation7 + $0x48] sm:$0xff]  ;;  %v1371_v19 = vld [vmem:[#allocation7 + $0x40] sm:$0xff] }
  0x1e   :  { %v1370_v20 = vld [vmem:[#allocation7 + $0x38] sm:$0xff]  ;;  %v1683_v21 = vld [vmem:[#allocation5 + $0x18] sm:$0xff]  ;;  %v1685_v22 = vld [vmem:[#allocation5 + $0x30] sm:$0xff] }
  0x1f   :  { %v1369_v23 = vld [vmem:[#allocation7 + $0x30] sm:$0xff]  ;;  %v1368_v24 = vld [vmem:[#allocation7 + $0x28] sm:$0xff]  ;;  %v1367_v25 = vld [vmem:[#allocation7 + $0x20] sm:$0xff] }
  0x20   :  { %229 = vmatpush.bf16.msra.mxu0 %v1351_v2  ;;  %1413 = vmatpush.bf16.msra.mxu3 %v1351_v2  ;;  %v1366_v26 = vld [vmem:[#allocation7 + $0x18] sm:$0xff]  ;;  %v1691_v28 = vld [vmem:[#allocation5 + $0x38] sm:$0xff]  ;;  %v1364_v30 = vld [vmem:[#allocation7 + $0x8] sm:$0xff] }
  0x21   :  { %1420 = vmatpush.bf16.msra.mxu2 %v1377_v11  ;;  %365 = vmatpush.bf16.msra.mxu1 %v1377_v11  ;;  %v1689_v27 = vld [vmem:[#allocation5 + $0x20] sm:$0xff]  ;;  %v1365_v29 = vld [vmem:[#allocation7 + $0x10] sm:$0xff]  ;;  %v1363_v31 = vld [vmem:[#allocation7] sm:$0xff] }
  0x22   :  { %v1394_v52 = vld [vmem:[#allocation7 + $0xf8] sm:$0xff]  ;;  %v1393_v53 = vld [vmem:[#allocation7 + $0xf0] sm:$0xff]  ;;  %v1392_v55 = vld [vmem:[#allocation7 + $0xe8] sm:$0xff] }
  0x23   :  { %v1391_v57 = vld [vmem:[#allocation7 + $0xe0] sm:$0xff]  ;;  %v1390_v61 = vld [vmem:[#allocation7 + $0xd8] sm:$0xff]  ;;  %v1389_v63 = vld [vmem:[#allocation7 + $0xd0] sm:$0xff] }
  0x24   :  { %230 = vmatpush.bf16.msra.mxu0 %v1659_v3  ;;  %1414 = vmatpush.bf16.msra.mxu3 %v1659_v3 }
  0x25   :  { %1421 = vmatpush.bf16.msra.mxu2 %v1376_v12  ;;  %366 = vmatpush.bf16.msra.mxu1 %v1376_v12 }
  0x28   :  { %231 = vmatpush.bf16.msra.mxu0 %v1662_v4  ;;  %1415 = vmatpush.bf16.msra.mxu3 %v1662_v4 }
  0x29   :  { %1422 = vmatpush.bf16.msra.mxu2 %v1375_v13  ;;  %367 = vmatpush.bf16.msra.mxu1 %v1375_v13  ;;  %v1712_v13 = vld [vmem:[#allocation8] ss:$0 sm:$0xff] }
  0x2c   :  { %232 = vmatpush.bf16.msra.mxu0 %v1666_v5  ;;  %1416 = vmatpush.bf16.msra.mxu3 %v1666_v5 }
  0x2d   :  { %1423 = vmatpush.bf16.msra.mxu2 %v1374_v15  ;;  %368 = vmatpush.bf16.msra.mxu1 %v1374_v15 }
  0x30   :  { %233 = vmatpush.bf16.msra.mxu0 %v1347_v6  ;;  %1417 = vmatpush.bf16.msra.mxu3 %v1347_v6 }
  0x31   :  { %1424 = vmatpush.bf16.msra.mxu2 %v1373_v17  ;;  %369 = vmatpush.bf16.msra.mxu1 %v1373_v17 }
  0x34   :  { %234 = vmatpush.bf16.msra.mxu0 %v1346_v7  ;;  %1418 = vmatpush.bf16.msra.mxu3 %v1346_v7 }
  0x35   :  { %1425 = vmatpush.bf16.msra.mxu2 %v1372_v18  ;;  %370 = vmatpush.bf16.msra.mxu1 %v1372_v18 }
  0x37   :  { %235 = vmatmul.bf16.vlgmr.msra.gmra.mxu0 %v1671_v8  ;;  %260 = vmatmul.bf16.vlgmr.msra.gmra.mxu3 %v1680_v16 }
  0x38   :  { %689 = vmatpush.bf16.msrb.mxu0 %v1394_v52 }
  0x39   :  { %1426 = vmatpush.bf16.msra.mxu2 %v1371_v19  ;;  %371 = vmatpush.bf16.msra.mxu1 %v1371_v19 }
  0x3c   :  { %397 = vmatmul.bf16.vlgmr.msra.gmra.mxu2 %v1351_v2  ;;  %372 = vmatmul.bf16.vlgmr.msra.gmra.mxu1 %v1346_v7 }
  0x3d   :  { %461 = vmatpush.bf16.msrb.mxu2 %v1370_v20  ;;  %690 = vmatpush.bf16.msrb.mxu0 %v1393_v53 }
  0x41   :  { %462 = vmatpush.bf16.msrb.mxu2 %v1369_v23  ;;  %691 = vmatpush.bf16.msrb.mxu0 %v1392_v55 }
  0x45   :  { %463 = vmatpush.bf16.msrb.mxu2 %v1368_v24  ;;  %692 = vmatpush.bf16.msrb.mxu0 %v1391_v57 }
  0x47   :  { %240 = vmatmul.bf16.gmra.mxu0 %v1674_v9  ;;  %265 = vmatmul.bf16.gmra.mxu3 %v1685_v22 }
  0x49   :  { %464 = vmatpush.bf16.msrb.mxu2 %v1367_v25  ;;  %693 = vmatpush.bf16.msrb.mxu0 %v1390_v61 }
  0x4c   :  { %402 = vmatmul.bf16.gmra.mxu2 %v1654_v1  ;;  %377 = vmatmul.bf16.gmra.mxu1 %v1347_v6  ;;  %v1388_v1 = vld [vmem:[#allocation7 + $0xc8] sm:$0xff] }
  0x4d   :  { %465 = vmatpush.bf16.msrb.mxu2 %v1366_v26  ;;  %694 = vmatpush.bf16.msrb.mxu0 %v1389_v63 }
  0x51   :  { %466 = vmatpush.bf16.msrb.mxu2 %v1365_v29  ;;  %695 = vmatpush.bf16.msrb.mxu0 %v1388_v1 }
  0x55   :  { %467 = vmatpush.bf16.msrb.mxu2 %v1364_v30 }
  0x57   :  { %245 = vmatmul.bf16.gmra.mxu0 %v1677_v14  ;;  %270 = vmatmul.bf16.gmra.mxu3 %v1691_v28 }
  0x59   :  { %468 = vmatpush.bf16.msrb.mxu2 %v1363_v31 }
  0x5c   :  { %407 = vmatmul.bf16.gmra.mxu2 %v1651_v0  ;;  %382 = vmatmul.bf16.gmra.mxu1 %v1666_v5 }
  0x67   :  { %250 = vmatmul.bf16.gmra.mxu0 %v1683_v21 }
  0x6c   :  { %387 = vmatmul.bf16.gmra.mxu1 %v1662_v4  ;;  %v1387_v4 = vld [vmem:[#allocation7 + $0xc0] sm:$0xff] }
  0x6d   :  { %696 = vmatpush.bf16.msrb.mxu0 %v1387_v4 }
  0x77   :  { %255 = vmatmul.bf16.gmra.mxu0 %v1689_v27 }
  0x7c   :  { %392 = vmatmul.bf16.gmra.mxu1 %v1659_v3 }
  0xb4   :  { %v236_v32 = vpop.f32.mrf.mxu0 }
  0xb9   :  { %v373_v3 = vpop.f32.mrf.mxu1 }
  0xba   :  { %v261_v45 = vpop.f32.mrf.mxu3 }
  0xbc   :  { %v238_v33 = vpop.f32.mrf.mxu0 }
  0xbd   :  { %v276_v34 = vpack.c.bf16 %v238_v33, %v236_v32 }
  0xbf   :  { %469 = vmatmul.bf16.vlgmr.msrb.gmra.mxu2 %v276_v34  ;;  %v1700_v49 = vpop.f32.mrf.mxu2 }
  0xc1   :  { %v375_v6 = vpop.f32.mrf.mxu1 }
  0xc2   :  { %v263_v48 = vpop.f32.mrf.mxu3 }
  0xc3   :  { %v281_v51 = vpack.c.bf16 %v263_v48, %v261_v45 }
  0xc4   :  { %v241_v35 = vpop.f32.mrf.mxu0 }
  0xc7   :  { %v1702_v54 = vpop.f32.mrf.mxu2 }
  0xc9   :  { %v378_v11 = vpop.f32.mrf.mxu1 }
  0xca   :  { %v266_v50 = vpop.f32.mrf.mxu3 }
  0xcc   :  { %v243_v36 = vpop.f32.mrf.mxu0 }
  0xcd   :  { %v277_v37 = vpack.c.bf16 %v243_v36, %v241_v35 }
  0xcf   :  { %474 = vmatmul.bf16.gmra.mxu2 %v277_v37  ;;  %v1704_v58 = vpop.f32.mrf.mxu2 }
  0xd1   :  { %v380_v19 = vpop.f32.mrf.mxu1 }
  0xd2   :  { %v268_v56 = vpop.f32.mrf.mxu3 }
  0xd3   :  { %v282_v59 = vpack.c.bf16 %v268_v56, %v266_v50 }
  0xd4   :  { %v246_v38 = vpop.f32.mrf.mxu0 }
  0xd7   :  { %v1706_v62 = vpop.f32.mrf.mxu2 }
  0xd9   :  { %v383_v29 = vpop.f32.mrf.mxu1 }
  0xda   :  { %v271_v60 = vpop.f32.mrf.mxu3 }
  0xdc   :  { %v248_v39 = vpop.f32.mrf.mxu0 }
  0xdd   :  { %v278_v40 = vpack.c.bf16 %v248_v39, %v246_v38 }
  0xdf   :  { %479 = vmatmul.bf16.gmra.mxu2 %v278_v40  ;;  %v1708_v5 = vpop.f32.mrf.mxu2 }
  0xe1   :  { %v385_v37 = vpop.f32.mrf.mxu1 }
  0xe2   :  { %v273_v0 = vpop.f32.mrf.mxu3 }
  0xe3   :  { %v283_v2 = vpack.c.bf16 %v273_v0, %v271_v60 }
  0xe4   :  { %v251_v41 = vpop.f32.mrf.mxu0 }
  0xe7   :  { %v1710_v7 = vpop.f32.mrf.mxu2 }
  0xec   :  { %v253_v42 = vpop.f32.mrf.mxu0 }
  0xed   :  { %v279_v43 = vpack.c.bf16 %v253_v42, %v251_v41  ;;  %v388_v42 = vpop.f32.mrf.mxu1 }
  0xef   :  { %484 = vmatmul.bf16.gmra.mxu2 %v279_v43 }
  0xf4   :  { %v256_v44 = vpop.f32.mrf.mxu0 }
  0xfc   :  { %v258_v46 = vpop.f32.mrf.mxu0 }
  0xfd   :  { %v280_v47 = vpack.c.bf16 %v258_v46, %v256_v44 }
  0xff   :  { %489 = vmatmul.bf16.gmra.mxu2 %v280_v47 }
 0x10f   :  { %494 = vmatmul.bf16.gmra.mxu2 %v281_v51  ;;  %v390_v51 = vpop.f32.mrf.mxu1 }
 0x11f   :  { %499 = vmatmul.bf16.gmra.mxu2 %v282_v59  ;;  %v393_v59 = vpop.f32.mrf.mxu1 }
 0x12f   :  { %504 = vmatmul.bf16.gmra.mxu2 %v283_v2  ;;  %v395_v2 = vpop.f32.mrf.mxu1 }
 0x142   :  { %v470_v10 = vpop.f32.mrf.mxu2 }
 0x143   :  { %v471_v12 = vadd.f32 %v470_v10, %v373_v3 }
 0x145   :  { %v512_v17 = vadd.f32 %v1712_v13, %v471_v12 }
 0x147   :  { %v528_v23 = vmax.f32 %v512_v17, 0.0 }
 0x14a   :  { %v472_v15 = vpop.f32.mrf.mxu2 }
 0x14b   :  { %v473_v18 = vadd.f32 %v472_v15, %v375_v6 }
 0x14d   :  { %v513_v20 = vadd.f32 %v1712_v13, %v473_v18 }
 0x14f   :  { %v529_v24 = vmax.f32 %v513_v20, 0.0 }
 0x151   :  { %v1716_v25 = vpack.c.bf16 %v529_v24, %v528_v23 }
 0x152   :  { %v475_v26 = vpop.f32.mrf.mxu2 }
 0x153   :  { %697 = vmatmul.bf16.vlgmr.msrb.gmra.mxu0 %v1716_v25  ;;  %v476_v30 = vadd.f32 %v475_v26, %v378_v11 }
 0x155   :  { %v514_v32 = vadd.f32 %v1712_v13, %v476_v30 }
 0x157   :  { %v530_v35 = vmax.f32 %v514_v32, 0.0 }
 0x15a   :  { %v477_v31 = vpop.f32.mrf.mxu2 }
 0x15b   :  { %v478_v33 = vadd.f32 %v477_v31, %v380_v19 }
 0x15d   :  { %v515_v34 = vadd.f32 %v1712_v13, %v478_v33 }
 0x15f   :  { %v531_v36 = vmax.f32 %v515_v34, 0.0 }
 0x161   :  { %v1721_v38 = vpack.c.bf16 %v531_v36, %v530_v35 }
 0x162   :  { %v480_v39 = vpop.f32.mrf.mxu2 }
 0x163   :  { %702 = vmatmul.bf16.gmra.mxu0 %v1721_v38  ;;  %v481_v40 = vadd.f32 %v480_v39, %v383_v29 }
 0x165   :  { %v516_v43 = vadd.f32 %v1712_v13, %v481_v40 }
 0x167   :  { %v532_v46 = vmax.f32 %v516_v43, 0.0 }
 0x16a   :  { %v482_v41 = vpop.f32.mrf.mxu2 }
 0x16b   :  { %v483_v44 = vadd.f32 %v482_v41, %v385_v37 }
 0x16d   :  { %v517_v45 = vadd.f32 %v1712_v13, %v483_v44 }
 0x16f   :  { %v533_v47 = vmax.f32 %v517_v45, 0.0 }
 0x171   :  { %v546_v48 = vpack.c.bf16 %v533_v47, %v532_v46 }
 0x172   :  { %v485_v50 = vpop.f32.mrf.mxu2 }
 0x173   :  { %707 = vmatmul.bf16.gmra.mxu0 %v546_v48  ;;  %v486_v52 = vadd.f32 %v485_v50, %v388_v42 }
 0x175   :  { %v518_v55 = vadd.f32 %v1712_v13, %v486_v52 }
 0x177   :  { %v534_v60 = vmax.f32 %v518_v55, 0.0 }
 0x17a   :  { %v487_v53 = vpop.f32.mrf.mxu2 }
 0x17b   :  { %v488_v56 = vadd.f32 %v487_v53, %v390_v51 }
 0x17d   :  { %v519_v57 = vadd.f32 %v1712_v13, %v488_v56 }
 0x17f   :  { %v535_v61 = vmax.f32 %v519_v57, 0.0 }
 0x181   :  { %v547_v63 = vpack.c.bf16 %v535_v61, %v534_v60 }
 0x182   :  { %v490_v0 = vpop.f32.mrf.mxu2 }
 0x183   :  { %712 = vmatmul.bf16.gmra.mxu0 %v547_v63  ;;  %v491_v1 = vadd.f32 %v490_v0, %v393_v59 }
 0x185   :  { %v520_v4 = vadd.f32 %v1712_v13, %v491_v1 }
 0x187   :  { %v536_v11 = vmax.f32 %v520_v4, 0.0 }
 0x18a   :  { %v492_v3 = vpop.f32.mrf.mxu2 }
 0x18b   :  { %v493_v6 = vadd.f32 %v492_v3, %v395_v2 }
 0x18d   :  { %v521_v10 = vadd.f32 %v1712_v13, %v493_v6 }
 0x18f   :  { %v537_v12 = vmax.f32 %v521_v10, 0.0 }
 0x191   :  { %v548_v15 = vpack.c.bf16 %v537_v12, %v536_v11 }
 0x192   :  { %v495_v17 = vpop.f32.mrf.mxu2 }
 0x193   :  { %717 = vmatmul.bf16.gmra.mxu0 %v548_v15  ;;  %v496_v18 = vadd.f32 %v495_v17, %v1700_v49 }
 0x195   :  { %v522_v20 = vadd.f32 %v1712_v13, %v496_v18  ;;  %v1752_v18 = vld [vmem:[#allocation8 + $0x1] ss:$0 sm:$0xff] }
 0x197   :  { %v538_v26 = vmax.f32 %v522_v20, 0.0 }
 0x19a   :  { %v497_v19 = vpop.f32.mrf.mxu2 }
 0x19b   :  { %v498_v23 = vadd.f32 %v497_v19, %v1702_v54 }
 0x19d   :  { %v523_v24 = vadd.f32 %v1712_v13, %v498_v23 }
 0x19f   :  { %v539_v29 = vmax.f32 %v523_v24, 0.0 }
 0x1a1   :  { %v549_v30 = vpack.c.bf16 %v539_v29, %v538_v26 }
 0x1a2   :  { %v500_v31 = vpop.f32.mrf.mxu2 }
 0x1a3   :  { %722 = vmatmul.bf16.gmra.mxu0 %v549_v30  ;;  %v501_v32 = vadd.f32 %v500_v31, %v1704_v58 }
 0x1a5   :  { %v524_v34 = vadd.f32 %v1712_v13, %v501_v32 }
 0x1a7   :  { %v540_v36 = vmax.f32 %v524_v34, 0.0 }
 0x1aa   :  { %v502_v33 = vpop.f32.mrf.mxu2 }
 0x1ab   :  { %v503_v35 = vadd.f32 %v502_v33, %v1706_v62  ;;  %v1386_v62 = vld [vmem:[#allocation7 + $0xb8] sm:$0xff] }
 0x1ac   :  { %786 = vmatpush.bf16.msrb.mxu1 %v1386_v62 }
 0x1ad   :  { %v525_v49 = vadd.f32 %v1712_v13, %v503_v35 }
 0x1af   :  { %v541_v37 = vmax.f32 %v525_v49, 0.0 }
 0x1b1   :  { %v550_v39 = vpack.c.bf16 %v541_v37, %v540_v36 }
 0x1b2   :  { %v505_v54 = vpop.f32.mrf.mxu2 }
 0x1b3   :  { %727 = vmatmul.bf16.gmra.mxu0 %v550_v39  ;;  %v506_v40 = vadd.f32 %v505_v54, %v1708_v5  ;;  %v1385_v5 = vld [vmem:[#allocation7 + $0xb0] sm:$0xff] }
 0x1b4   :  { %787 = vmatpush.bf16.msrb.mxu1 %v1385_v5 }
 0x1b5   :  { %v526_v42 = vadd.f32 %v1712_v13, %v506_v40 }
 0x1b7   :  { %v542_v44 = vmax.f32 %v526_v42, 0.0 }
 0x1ba   :  { %v507_v41 = vpop.f32.mrf.mxu2 }
 0x1bb   :  { %v508_v43 = vadd.f32 %v507_v41, %v1710_v7  ;;  %v1384_v7 = vld [vmem:[#allocation7 + $0xa8] sm:$0xff] }
 0x1bc   :  { %788 = vmatpush.bf16.msrb.mxu1 %v1384_v7 }
 0x1bd   :  { %v527_v58 = vadd.f32 %v1712_v13, %v508_v43  ;;  %v1383_v13 = vld [vmem:[#allocation7 + $0xa0] sm:$0xff] }
 0x1bf   :  { %v543_v45 = vmax.f32 %v527_v58, 0.0 }
 0x1c0   :  { %789 = vmatpush.bf16.msrb.mxu1 %v1383_v13 }
 0x1c1   :  { %v551_v46 = vpack.c.bf16 %v543_v45, %v542_v44 }
 0x1c3   :  { %552 = vmatpush.bf16.msrb.mxu3 %v551_v46  ;;  %732 = vmatmul.bf16.gmra.mxu0 %v551_v46 }
 0x1c7   :  { %553 = vmatpush.bf16.msrb.mxu3 %v550_v39 }
 0x1cb   :  { %554 = vmatpush.bf16.msrb.mxu3 %v549_v30 }
 0x1cf   :  { %555 = vmatpush.bf16.msrb.mxu3 %v548_v15 }
 0x1d0   :  { %v698_v2 = vpop.f32.mrf.mxu0 }
 0x1d3   :  { %556 = vmatpush.bf16.msrb.mxu3 %v547_v63 }
 0x1d7   :  { %557 = vmatpush.bf16.msrb.mxu3 %v546_v48 }
 0x1d8   :  { %v700_v4 = vpop.f32.mrf.mxu0 }
 0x1db   :  { %558 = vmatpush.bf16.msrb.mxu3 %v1721_v38 }
 0x1df   :  { %559 = vmatpush.bf16.msrb.mxu3 %v1716_v25  ;;  %v1382_v25 = vld [vmem:[#allocation7 + $0x98] sm:$0xff] }
 0x1e0   :  { %790 = vmatpush.bf16.msrb.mxu1 %v1382_v25  ;;  %v703_v11 = vpop.f32.mrf.mxu0 }
 0x1e2   :  { %560 = vmatmul.bf16.vlgmr.msrb.gmra.mxu3 %v1671_v8  ;;  %v1381_v8 = vld [vmem:[#allocation7 + $0x90] sm:$0xff] }
 0x1e4   :  { %791 = vmatpush.bf16.msrb.mxu1 %v1381_v8 }
 0x1e8   :  { %v705_v12 = vpop.f32.mrf.mxu0 }
 0x1f0   :  { %v708_v24 = vpop.f32.mrf.mxu0 }
 0x1f2   :  { %565 = vmatmul.bf16.gmra.mxu3 %v1674_v9  ;;  %v1380_v9 = vld [vmem:[#allocation7 + $0x88] sm:$0xff] }
 0x1f3   :  { %792 = vmatpush.bf16.msrb.mxu1 %v1380_v9 }
 0x1f8   :  { %v710_v33 = vpop.f32.mrf.mxu0 }
 0x200   :  { %v713_v40 = vpop.f32.mrf.mxu0 }
 0x202   :  { %570 = vmatmul.bf16.gmra.mxu3 %v1677_v14  ;;  %v1379_v14 = vld [vmem:[#allocation7 + $0x80] sm:$0xff] }
 0x203   :  { %793 = vmatpush.bf16.msrb.mxu1 %v1379_v14 }
 0x208   :  { %v715_v58 = vpop.f32.mrf.mxu0 }
 0x210   :  { %v718_v8 = vpop.f32.mrf.mxu0 }
 0x212   :  { %575 = vmatmul.bf16.gmra.mxu3 %v1683_v21 }
 0x222   :  { %580 = vmatmul.bf16.gmra.mxu3 %v1689_v27 }
 0x232   :  { %585 = vmatmul.bf16.gmra.mxu3 %v1680_v16 }
 0x242   :  { %590 = vmatmul.bf16.gmra.mxu3 %v1685_v22 }
 0x252   :  { %595 = vmatmul.bf16.gmra.mxu3 %v1691_v28 }
 0x265   :  { %v561_v21 = vpop.f32.mrf.mxu3 }
 0x26d   :  { %v563_v16 = vpop.f32.mrf.mxu3 }
 0x26e   :  { %v601_v27 = vpack.c.bf16 %v563_v16, %v561_v21 }
 0x270   :  { %794 = vmatmul.bf16.vlgmr.msrb.gmra.mxu1 %v601_v27 }
 0x275   :  { %v566_v38 = vpop.f32.mrf.mxu3 }
 0x27d   :  { %v568_v47 = vpop.f32.mrf.mxu3 }
 0x27e   :  { %v602_v48 = vpack.c.bf16 %v568_v47, %v566_v38  ;;  %v720_v38 = vpop.f32.mrf.mxu0 }
 0x280   :  { %799 = vmatmul.bf16.gmra.mxu1 %v602_v48 }
 0x285   :  { %v571_v50 = vpop.f32.mrf.mxu3 }
 0x28d   :  { %v573_v51 = vpop.f32.mrf.mxu3 }
 0x28e   :  { %v603_v52 = vpack.c.bf16 %v573_v51, %v571_v50 }
 0x290   :  { %804 = vmatmul.bf16.gmra.mxu1 %v603_v52 }
 0x295   :  { %v576_v22 = vpop.f32.mrf.mxu3 }
 0x29d   :  { %v578_v53 = vpop.f32.mrf.mxu3 }
 0x29e   :  { %v604_v55 = vpack.c.bf16 %v578_v53, %v576_v22  ;;  %v723_v22 = vpop.f32.mrf.mxu0 }
 0x2a0   :  { %809 = vmatmul.bf16.gmra.mxu1 %v604_v55 }
 0x2a5   :  { %v581_v56 = vpop.f32.mrf.mxu3 }
 0x2a6   :  { %v725_v55 = vpop.f32.mrf.mxu0 }
 0x2ad   :  { %v583_v57 = vpop.f32.mrf.mxu3 }
 0x2ae   :  { %v605_v59 = vpack.c.bf16 %v583_v57, %v581_v56 }
 0x2b0   :  { %814 = vmatmul.bf16.gmra.mxu1 %v605_v59  ;;  %v728_v59 = vpop.f32.mrf.mxu0 }
 0x2b5   :  { %v586_v28 = vpop.f32.mrf.mxu3 }
 0x2bd   :  { %v588_v60 = vpop.f32.mrf.mxu3 }
 0x2be   :  { %v606_v61 = vpack.c.bf16 %v588_v60, %v586_v28  ;;  %v730_v60 = vpop.f32.mrf.mxu0 }
 0x2c0   :  { %819 = vmatmul.bf16.gmra.mxu1 %v606_v61 }
 0x2c5   :  { %v591_v63 = vpop.f32.mrf.mxu3 }
 0x2cd   :  { %v593_v0 = vpop.f32.mrf.mxu3 }
 0x2ce   :  { %v607_v1 = vpack.c.bf16 %v593_v0, %v591_v63  ;;  %v733_v63 = vpop.f32.mrf.mxu0 }
 0x2d0   :  { %824 = vmatmul.bf16.gmra.mxu1 %v607_v1 }
 0x2d5   :  { %v596_v3 = vpop.f32.mrf.mxu3 }
 0x2dd   :  { %v598_v6 = vpop.f32.mrf.mxu3 }
 0x2de   :  { %v608_v10 = vpack.c.bf16 %v598_v6, %v596_v3  ;;  %v735_v3 = vpop.f32.mrf.mxu0 }
 0x2e0   :  { %829 = vmatmul.bf16.gmra.mxu1 %v608_v10 }
 0x2ed   :  { %v795_v15 = vpop.f32.mrf.mxu1 }
 0x2ee   :  { %v796_v17 = vadd.f32 %v795_v15, %v698_v2 }
 0x2f0   :  { %v837_v20 = vadd.f32 %v1752_v18, %v796_v17 }
 0x2f2   :  { %v853_v29 = vmax.f32 %v837_v20, 0.0 }
 0x2f5   :  { %v797_v19 = vpop.f32.mrf.mxu1 }
 0x2f6   :  { %v798_v23 = vadd.f32 %v797_v19, %v700_v4 }
 0x2f8   :  { %v838_v26 = vadd.f32 %v1752_v18, %v798_v23 }
 0x2fa   :  { %v854_v30 = vmax.f32 %v838_v26, 0.0 }
 0x2fc   :  { %v1756_v31 = vpack.c.bf16 %v854_v30, %v853_v29 }
 0x2fd   :  { %v800_v32 = vpop.f32.mrf.mxu1 }
 0x2fe   :  { %v801_v34 = vadd.f32 %v800_v32, %v703_v11 }
 0x300   :  { %v839_v49 = vadd.f32 %v1752_v18, %v801_v34 }
 0x302   :  { %v855_v39 = vmax.f32 %v839_v49, 0.0  ;;  %v1401_v49 = vld [vmem:[#allocation7 + $0x130] sm:$0xff] }
 0x305   :  { %v802_v35 = vpop.f32.mrf.mxu1 }
 0x306   :  { %v803_v36 = vadd.f32 %v802_v35, %v705_v12 }
 0x308   :  { %v840_v37 = vadd.f32 %v1752_v18, %v803_v36 }
 0x30a   :  { %v856_v54 = vmax.f32 %v840_v37, 0.0 }
 0x30c   :  { %v1760_v41 = vpack.c.bf16 %v856_v54, %v855_v39 }
 0x30d   :  { %v805_v42 = vpop.f32.mrf.mxu1 }
 0x30e   :  { %v806_v43 = vadd.f32 %v805_v42, %v708_v24  ;;  %v1400_v42 = vld [vmem:[#allocation7 + $0x128] sm:$0xff] }
 0x310   :  { %v841_v45 = vadd.f32 %v1752_v18, %v806_v43 }
 0x312   :  { %v857_v5 = vmax.f32 %v841_v45, 0.0  ;;  %v1399_v45 = vld [vmem:[#allocation7 + $0x120] sm:$0xff] }
 0x315   :  { %v807_v44 = vpop.f32.mrf.mxu1 }
 0x316   :  { %v808_v46 = vadd.f32 %v807_v44, %v710_v33  ;;  %v1402_v33 = vld [vmem:[#allocation7 + $0x138] sm:$0xff] }
 0x317   :  { %964 = vmatpush.bf16.msra.mxu3 %v1402_v33 }
 0x318   :  { %v842_v62 = vadd.f32 %v1752_v18, %v808_v46 }
 0x31a   :  { %v858_v7 = vmax.f32 %v842_v62, 0.0  ;;  %v1398_v62 = vld [vmem:[#allocation7 + $0x118] sm:$0xff] }
 0x31b   :  { %965 = vmatpush.bf16.msra.mxu3 %v1401_v49 }
 0x31c   :  { %v1764_v13 = vpack.c.bf16 %v858_v7, %v857_v5  ;;  %v1397_v5 = vld [vmem:[#allocation7 + $0x110] sm:$0xff]  ;;  %v1396_v7 = vld [vmem:[#allocation7 + $0x108] sm:$0xff] }
 0x31d   :  { %v810_v25 = vpop.f32.mrf.mxu1 }
 0x31e   :  { %v811_v9 = vadd.f32 %v810_v25, %v713_v40  ;;  %v1395_v25 = vld [vmem:[#allocation7 + $0x100] sm:$0xff] }
 0x31f   :  { %966 = vmatpush.bf16.msra.mxu3 %v1400_v42 }
 0x320   :  { %v843_v21 = vadd.f32 %v1752_v18, %v811_v9  ;;  %v1409_v9 = vld [vmem:[#allocation7 + $0x170] sm:$0xff] }
 0x322   :  { %v859_v47 = vmax.f32 %v843_v21, 0.0  ;;  %v1407_v21 = vld [vmem:[#allocation7 + $0x160] sm:$0xff] }
 0x323   :  { %967 = vmatpush.bf16.msra.mxu3 %v1399_v45 }
 0x325   :  { %v812_v14 = vpop.f32.mrf.mxu1 }
 0x326   :  { %v813_v16 = vadd.f32 %v812_v14, %v715_v58  ;;  %v1408_v14 = vld [vmem:[#allocation7 + $0x168] sm:$0xff] }
 0x327   :  { %968 = vmatpush.bf16.msra.mxu3 %v1398_v62 }
 0x328   :  { %v844_v27 = vadd.f32 %v1752_v18, %v813_v16 }
 0x32a   :  { %v860_v48 = vmax.f32 %v844_v27, 0.0 }
 0x32b   :  { %969 = vmatpush.bf16.msra.mxu3 %v1397_v5 }
 0x32c   :  { %v872_v50 = vpack.c.bf16 %v860_v48, %v859_v47  ;;  %v1403_v47 = vld [vmem:[#allocation7 + $0x140] sm:$0xff] }
 0x32d   :  { %v815_v51 = vpop.f32.mrf.mxu1 }
 0x32e   :  { %v816_v52 = vadd.f32 %v815_v51, %v718_v8  ;;  %v1410_v8 = vld [vmem:[#allocation7 + $0x178] sm:$0xff] }
 0x32f   :  { %970 = vmatpush.bf16.msra.mxu3 %v1396_v7 }
 0x330   :  { %v845_v54 = vadd.f32 %v1752_v18, %v816_v52  ;;  %v978_v52 = vld [vmem:[#allocation10] sm:$0xff] }
 0x332   :  { %v861_v44 = vmax.f32 %v845_v54, 0.0 }
 0x333   :  { %971 = vmatpush.bf16.msra.mxu3 %v1395_v25 }
 0x335   :  { %v817_v53 = vpop.f32.mrf.mxu1 }
 0x336   :  { %v818_v26 = vadd.f32 %v817_v53, %v720_v38  ;;  %v1404_v38 = vld [vmem:[#allocation7 + $0x148] sm:$0xff]  ;;  %v979_v53 = vld [vmem:[#allocation10 + $0x8] sm:$0xff] }
 0x338   :  { %v846_v36 = vadd.f32 %v1752_v18, %v818_v26 }
 0x33a   :  { %v862_v43 = vmax.f32 %v846_v36, 0.0 }
 0x33c   :  { %v873_v46 = vpack.c.bf16 %v862_v43, %v861_v44 }
 0x33d   :  { %v820_v56 = vpop.f32.mrf.mxu1 }
 0x33e   :  { %v821_v19 = vadd.f32 %v820_v56, %v723_v22 }
 0x340   :  { %v847_v34 = vadd.f32 %v1752_v18, %v821_v19 }
 0x342   :  { %v863_v40 = vmax.f32 %v847_v34, 0.0 }
 0x345   :  { %v822_v57 = vpop.f32.mrf.mxu1 }
 0x346   :  { %v823_v12 = vadd.f32 %v822_v57, %v725_v55 }
 0x348   :  { %v848_v29 = vadd.f32 %v1752_v18, %v823_v12 }
 0x34a   :  { %v864_v37 = vmax.f32 %v848_v29, 0.0 }
 0x34c   :  { %v874_v58 = vpack.c.bf16 %v864_v37, %v863_v40 }
 0x34d   :  { %v825_v28 = vpop.f32.mrf.mxu1 }
 0x34e   :  { %v826_v6 = vadd.f32 %v825_v28, %v728_v59  ;;  %v1440_v28 = vld [vmem:[#allocation8 + $0x3] ss:$0 sm:$0xff] }
 0x350   :  { %v849_v20 = vadd.f32 %v1752_v18, %v826_v6 }
 0x352   :  { %v865_v35 = vmax.f32 %v849_v20, 0.0 }
 0x355   :  { %v827_v61 = vpop.f32.mrf.mxu1 }
 0x356   :  { %v828_v2 = vadd.f32 %v827_v61, %v730_v60 }
 0x358   :  { %v850_v15 = vadd.f32 %v1752_v18, %v828_v2 }
 0x35a   :  { %v866_v30 = vmax.f32 %v850_v15, 0.0 }
 0x35c   :  { %v875_v39 = vpack.c.bf16 %v866_v30, %v865_v35 }
 0x35d   :  { %v830_v0 = vpop.f32.mrf.mxu1 }
 0x35e   :  { %v831_v1 = vadd.f32 %v830_v0, %v733_v63 }
 0x360   :  { %v851_v10 = vadd.f32 %v1752_v18, %v831_v1 }
 0x362   :  { %v867_v23 = vmax.f32 %v851_v10, 0.0 }
 0x365   :  { %v832_v4 = vpop.f32.mrf.mxu1 }
 0x366   :  { %v833_v11 = vadd.f32 %v832_v4, %v735_v3 }
 0x368   :  { %v852_v17 = vadd.f32 %v1752_v18, %v833_v11  ;;  %v1362_v18 = vld [vmem:[#allocation5 + $0x40] sm:$0xff] }
 0x36a   :  { %v868_v24 = vmax.f32 %v852_v17, 0.0 }
 0x36c   :  { %v876_v32 = vpack.c.bf16 %v868_v24, %v867_v23 }
 0x36e   :  { %883 = vmatpush.bf16.msra.mxu2 %v876_v32 }
 0x372   :  { %884 = vmatpush.bf16.msra.mxu2 %v875_v39 }
 0x376   :  { %885 = vmatpush.bf16.msra.mxu2 %v874_v58 }
 0x37a   :  { %886 = vmatpush.bf16.msra.mxu2 %v873_v46 }
 0x37e   :  { %887 = vmatpush.bf16.msra.mxu2 %v872_v50  ;;  %v1439_v50 = vld [vmem:[#allocation8 + $0x2] ss:$0 sm:$0xff] }
 0x382   :  { %888 = vmatpush.bf16.msra.mxu2 %v1764_v13 }
 0x386   :  { %889 = vmatpush.bf16.msra.mxu2 %v1760_v41  ;;  %v1406_v41 = vld [vmem:[#allocation7 + $0x158] sm:$0xff] }
 0x38a   :  { %890 = vmatpush.bf16.msra.mxu2 %v1756_v31  ;;  %v1405_v31 = vld [vmem:[#allocation7 + $0x150] sm:$0xff] }
 0x38d   :  { %891 = vmatmul.bf16.vlgmr.msra.gmra.mxu2 %v1362_v18 }
 0x38e   :  { %1049 = vmatpush.bf16.msrb.mxu2 %v1410_v8 }
 0x392   :  { %1050 = vmatpush.bf16.msrb.mxu2 %v1409_v9 }
 0x396   :  { %1051 = vmatpush.bf16.msrb.mxu2 %v1408_v14 }
 0x39a   :  { %1052 = vmatpush.bf16.msrb.mxu2 %v1407_v21 }
 0x39e   :  { %1053 = vmatpush.bf16.msrb.mxu2 %v1406_v41 }
 0x3a2   :  { %1054 = vmatpush.bf16.msrb.mxu2 %v1405_v31 }
 0x3a6   :  { %1055 = vmatpush.bf16.msrb.mxu2 %v1404_v38 }
 0x3aa   :  { %1056 = vmatpush.bf16.msrb.mxu2 %v1403_v47 }
 0x410   :  { %v892_v13 = vpop.f32.mrf.mxu2 }
 0x418   :  { %v894_v16 = vpop.f32.mrf.mxu2 }
 0x419   :  { %v897_v27 = vpack.c.bf16 %v894_v16, %v892_v13 }
 0x41b   :  { %972 = vmatmul.bf16.vlgmr.msra.gmra.mxu3 %v897_v27 }
 0x49e   :  { %v973_v48 = vpop.f32.mrf.mxu3 }
 0x49f   :  { %v974_v51 = vadd.f32 %v1439_v50, %v973_v48 }
 0x4a1   :  { %v980_v56 = vmul.f32 %v978_v52, %v974_v51 }
 0x4a6   :  { %v975_v22 = vpop.f32.mrf.mxu3 }
 0x4a7   :  { %v976_v55 = vadd.f32 %v1439_v50, %v975_v22 }
 0x4a9   :  { %v981_v57 = vmul.f32 %v979_v53, %v976_v55 }
 0x4ab   :  { %v982_v59 = vpack.c.bf16 %v981_v57, %v980_v56 }
 0x4ad   :  { %1057 = vmatmul.bf16.vlgmr.msrb.gmra.mxu2 %v982_v59 }
 0x530   :  { %v1058_v60 = vpop.f32.mrf.mxu2 }
 0x531   :  { %v1059_v61 = vadd.f32 %v1440_v28, %v1058_v60 }
 0x533   :  { %1063 = vst [vmem:[#allocation11] sm:$0xff] %v1059_v61 }
 0x538   :  { %v1060_v63 = vpop.f32.mrf.mxu2 }
 0x539   :  { %v1061_v0 = vadd.f32 %v1440_v28, %v1060_v63 }
 0x53b   :  { %1064 = vst [vmem:[#allocation11 + $0x8] sm:$0xff] %v1061_v0 }
 0x53c   :  { %1077 = dma.vmem_to_hbm [thread:$0]  %s1070_s4, 256, %s1072_s21, [#allocation4], %s1600_s17, %s1600_s17, %s1601_s18  }
 0x53d   :  { %1591 = dma.done.wait [#allocation4], 256  }
 0x53e   :  { %1592 = vsyncadd [#allocation4], 4294967040 }
 0x53f   :  { %1082 = vsyncpa [#allocation3], 1 }
 0x540   :  { %1083 = vsyncpa [#allocation6], 1 }
 0x541   :  { %1084 = vsyncpa [#allocation9], 1 }
 0x542   :  { %1085 = vsyncpa [#allocation4], 1 }

</bundles_post_ra>
